<compile_context>
chip_gen: v6e
topology: v6e:2x2x1
jax: 0.10.0
libtpu: 0.0.40
codegen_flags: <defaults>
</compile_context>

<pallas_src>
import jax
import jax.numpy as jnp
from jax.experimental import pallas as pl
from jax.experimental.pallas import tpu as pltpu


def _mlp_kernel(x_ref, p_ref, o_ref):
    # x_ref : (TB, 1)   batch tile
    # p_ref : (4, H)    row 0 = w1 (as a row), row 1 = b1, row 2 = w2 (as a row),
    #                   row 3 = [b2, 0, ..., 0]
    x = x_ref[...]                                   # (TB, 1)
    w1 = p_ref[0:1, :]                               # (1, H)
    b1 = p_ref[1:2, :]                               # (1, H)
    w2 = p_ref[2:3, :]                               # (1, H)
    b2 = p_ref[3:4, 0:1]                             # (1, 1)

    # hidden layer: x @ W1 + b1 with K == 1 is just a broadcast multiply (VPU).
    h = jnp.maximum(x * w1 + b1, 0.0)                # (TB, H), ReLU on VPU

    # output layer: h @ W2 + b2 with N == 1 is a multiply + lane reduce (VPU + XLU).
    y = jnp.sum(h * w2, axis=-1, keepdims=True) + b2  # (TB, 1)

    o_ref[...] = y.astype(o_ref.dtype)


def pack_params(w1, b1, w2, b2):
    """Pack (w1:(1,H), b1:(1,H), w2:(H,1), b2:(1,1)) into a single (4, H) f32 array
    so the kernel needs one parameter DMA instead of four."""
    H = w1.shape[1]
    w2_row = w2.T                                           # (1, H)
    b2_row = jnp.zeros((1, H), b2.dtype).at[0, 0].set(b2[0, 0])
    return jnp.concatenate([w1, b1, w2_row, b2_row], axis=0)  # (4, H)


def net_forward(x, packed_params, *, batch_block=512):
    """x: (B, 1) f32; packed_params: (4, H) f32  ->  (B, 1) f32.

    Specialized to n_features == 1 and n_output == 1 (the module's actual usage);
    for large F/O the general path would go back to an MXU matmul kernel.
    """
    B, F = x.shape
    assert F == 1, "fast VPU path is specialized to n_features == 1"
    H = packed_params.shape[1]

    # Batch tile: full batch for small B; otherwise a multiple-of-8 block so the
    # (8, 128) tiling constraint holds and the batch axis can shard across
    # TensorCores (v7x) via dimension_semantics=("parallel",).
    if B <= batch_block:
        tb = B
    else:
        tb = max(8, (batch_block // 8) * 8)
    grid = (pl.cdiv(B, tb),)

    return pl.pallas_call(
        _mlp_kernel,
        out_shape=jax.ShapeDtypeStruct((B, 1), x.dtype),
        grid=grid,
        in_specs=[
            pl.BlockSpec((tb, 1), lambda i: (i, 0)),   # batch tile of x
            pl.BlockSpec((4, H), lambda i: (0, 0)),    # packed params, replicated
        ],
        out_specs=pl.BlockSpec((tb, 1), lambda i: (i, 0)),
        compiler_params=pltpu.CompilerParams(
            dimension_semantics=("parallel",),
        ),
    )(x, packed_params)


def init_params(key, n_features, n_hidden, n_output):
    """Deterministic init mimicking PyTorch Linear's U(-1/sqrt(fan_in), 1/sqrt(fan_in)).
    Weights stored as (in, out) so the math is x @ W (PyTorch stores (out, in))."""
    k1, k2, k3, k4 = jax.random.split(key, 4)
    bound1 = 1.0 / jnp.sqrt(jnp.float32(n_features))
    bound2 = 1.0 / jnp.sqrt(jnp.float32(n_hidden))
    w1 = jax.random.uniform(k1, (n_features, n_hidden), jnp.float32, -bound1, bound1)
    b1 = jax.random.uniform(k2, (1, n_hidden), jnp.float32, -bound1, bound1)
    w2 = jax.random.uniform(k3, (n_hidden, n_output), jnp.float32, -bound2, bound2)
    b2 = jax.random.uniform(k4, (1, n_output), jnp.float32, -bound2, bound2)
    return w1, b1, w2, b2


if __name__ == "__main__":
    # Shapes implied by the script: x = unsqueeze(linspace(-1, 1, 100), 1) -> (100, 1)
    # Net(n_features=1, n_hidden=10, n_output=1)
    n_features, n_hidden, n_output = 1, 10, 1

    key = jax.random.PRNGKey(0)
    w1, b1, w2, b2 = init_params(key, n_features, n_hidden, n_output)
    packed = pack_params(w1, b1, w2, b2)

    x = jnp.expand_dims(jnp.linspace(-1.0, 1.0, 100, dtype=jnp.float32), axis=1)  # (100, 1)

    out = net_forward(x, packed)
    out = jax.block_until_ready(out)

    # Reference check in plain JAX (original two-matmul formulation).
    ref = jnp.maximum(x @ w1 + b1, 0.0) @ w2 + b2
    assert out.shape == (100, n_output)
    assert jnp.allclose(out, ref, atol=1e-5, rtol=1e-5)

    print("KERNEL_OK")
</pallas_src>

<mosaic_0001>
module attributes {stable_mosaic.version = 11 : i64} {
  func.func @_mlp_kernel(%arg0: i32, %arg1: memref<100x1xf32, #tpu.memory_space<vmem>>, %arg2: memref<4x10xf32, #tpu.memory_space<vmem>>, %arg3: memref<100x1xf32, #tpu.memory_space<vmem>>) attributes {dimension_semantics = [#tpu.dimension_semantics<parallel>], iteration_bounds = array<i64: 1>, scalar_prefetch = 0 : i64, scratch_operands = 0 : i64, tpu.core_type = #tpu.core_type<tc>, window_params = [{transform_indices = @transform_0, window_bounds = array<i64: 100, 1>}, {pipeline_mode = #tpu.pipeline_mode<synchronous>, transform_indices = @transform_1, window_bounds = array<i64: 4, 10>}, {transform_indices = @transform_2, window_bounds = array<i64: 100, 1>}]} {
    %c0 = arith.constant 0 : index
    %c0_0 = arith.constant 0 : index
    %0 = vector.load %arg1[%c0, %c0_0] : memref<100x1xf32, #tpu.memory_space<vmem>>, vector<100x1xf32>
    %c0_1 = arith.constant 0 : index
    %c0_2 = arith.constant 0 : index
    %1 = vector.load %arg2[%c0_1, %c0_2] : memref<4x10xf32, #tpu.memory_space<vmem>>, vector<1x10xf32>
    %c1 = arith.constant 1 : index
    %c0_3 = arith.constant 0 : index
    %2 = vector.load %arg2[%c1, %c0_3] : memref<4x10xf32, #tpu.memory_space<vmem>>, vector<1x10xf32>
    %c2 = arith.constant 2 : index
    %c0_4 = arith.constant 0 : index
    %3 = vector.load %arg2[%c2, %c0_4] : memref<4x10xf32, #tpu.memory_space<vmem>>, vector<1x10xf32>
    %c3 = arith.constant 3 : index
    %c0_5 = arith.constant 0 : index
    %4 = vector.load %arg2[%c3, %c0_5] : memref<4x10xf32, #tpu.memory_space<vmem>>, vector<1x1xf32>
    %5 = vector.broadcast %0 : vector<100x1xf32> to vector<100x10xf32>
    %6 = vector.broadcast %1 : vector<1x10xf32> to vector<100x10xf32>
    %7 = arith.mulf %5, %6 : vector<100x10xf32>
    %8 = vector.broadcast %2 : vector<1x10xf32> to vector<100x10xf32>
    %9 = arith.addf %7, %8 : vector<100x10xf32>
    %cst = arith.constant 0.000000e+00 : f32
    %10 = vector.broadcast %cst : f32 to vector<100x10xf32>
    %11 = arith.maximumf %9, %10 : vector<100x10xf32>
    %12 = vector.broadcast %3 : vector<1x10xf32> to vector<100x10xf32>
    %13 = arith.mulf %11, %12 : vector<100x10xf32>
    %cst_6 = arith.constant dense<0.000000e+00> : vector<100xf32>
    %14 = vector.multi_reduction <add>, %13, %cst_6 [1] : vector<100x10xf32> to vector<100xf32>
    %15 = vector.shape_cast %14 : vector<100xf32> to vector<100x1xf32>
    %16 = vector.broadcast %4 : vector<1x1xf32> to vector<100x1xf32>
    %17 = arith.addf %15, %16 : vector<100x1xf32>
    %c0_7 = arith.constant 0 : index
    %c0_8 = arith.constant 0 : index
    %18 = vector.load %arg3[%c0_7, %c0_8] : memref<100x1xf32, #tpu.memory_space<vmem>>, vector<100x1xf32>
    tpu.vector_store %arg3[%c0_7, %c0_8], %17 {strides = array<i32>} : memref<100x1xf32, #tpu.memory_space<vmem>>, vector<100x1xf32>,
    return
  }
  func.func @transform_0(%arg0: i32) -> (i32, i32) {
    %c0_i32 = arith.constant 0 : i32
    %c0_i32_0 = arith.constant 0 : i32
    return %arg0, %c0_i32 : i32, i32
  }
  func.func @transform_1(%arg0: i32) -> (i32, i32) {
    %c0_i32 = arith.constant 0 : i32
    %c0_i32_0 = arith.constant 0 : i32
    %c0_i32_1 = arith.constant 0 : i32
    return %c0_i32, %c0_i32_0 : i32, i32
  }
  func.func @transform_2(%arg0: i32) -> (i32, i32) {
    %c0_i32 = arith.constant 0 : i32
    %c0_i32_0 = arith.constant 0 : i32
    return %arg0, %c0_i32 : i32, i32
  }
}

</mosaic_0001>

<bundles_post_ra>
// kernel: tpu_custom_call.1
= control target key start
LH: loop header
LB: loop body
LE: loop exit
PB: predicated region body
PF: predicated region fallthrough
CT: control target
= control target key end

     0   :  { %v241_v0 = vmov 0   ;;  %vm157_vm0 = vcmask 80896   ;;  %vm194_vm1 = vcmask 76800   ;;  %vm215_vm2 = vcmask 7168   ;;  %s416_s0 = inlined_call_operand.vmem [shape: f32[100,1], index: 0, kind: input, shape index: {}]   ;;  %s417_s1 = inlined_call_operand.vmem [shape: f32[4,10], index: 1, kind: input, shape index: {}]   ;;  %s418_s2 = inlined_call_operand.vmem [shape: f32[100,1], index: 2, kind: output, shape index: {}]  }
   0x1   :  { %240 = vset.pattern.permute.xlu1 %v241_v0  ;;  %239 = vset.pattern.permute.xlu0 %v241_v0  ;;  %v13_v1 = vld [vmem:[%s416_s0 + $0x10] sm:$0xff]  ;;  %v11_v2 = vld [vmem:[%s416_s0] sm:$0xff]  ;;  %v14_v3 = vld [vmem:[%s416_s0 + $0x18] sm:$0xff]  ;;  %vm228_vm3 = vcmask 3072  }
   0x2   :  { %40 = vperm.xlu1 %240, %v13_v1   ;;  %30 = vperm.xlu0 %239, %v11_v2   ;;  %v12_v4 = vld [vmem:[%s416_s0 + $0x8] sm:$0xff]  ;;  %v15_v6 = vld [vmem:[%s416_s0 + $0x20] sm:$0xff]  ;;  %v18_v7 = vld [vmem:[%s416_s0 + $0x38] sm:$0xff] }
   0x3   :  { %v16_v5 = vld [vmem:[%s416_s0 + $0x28] sm:$0xff]  ;;  %v17_v8 = vld [vmem:[%s416_s0 + $0x30] sm:$0xff]  ;;  %v19_v10 = vld [vmem:[%s416_s0 + $0x40] sm:$0xff] }
   0x4   :  { %v20_v9 = vld [vmem:[%s416_s0 + $0x48] sm:$0xff]  ;;  %v22_v11 = vld [vmem:[%s416_s0 + $0x58] sm:$0xff]  ;;  %v21_v12 = vld [vmem:[%s416_s0 + $0x50] sm:$0xff] }
   0x5   :  { %v23_v13 = vld [vmem:[%s416_s0 + $0x60] sm:$0xf] }
   0x6   :  { %45 = vperm.xlu1 %240, %v14_v3   ;;  %35 = vperm.xlu0 %239, %v12_v4   ;;  %v299_v14 = vld [vmem:[%s417_s1] ss:$0 sm:$0xff]  ;;  %v304_v15 = vld [vmem:[%s417_s1 + $0x1] ss:$0 sm:$0xff]  ;;  %v313_v24 = vld [vmem:[%s417_s1 + $0x2] ss:$0 sm:$0xff] }
   0xa   :  { %55 = vperm.xlu1 %240, %v16_v5   ;;  %50 = vperm.xlu0 %239, %v15_v6  }
   0xe   :  { %65 = vperm.xlu1 %240, %v18_v7   ;;  %60 = vperm.xlu0 %239, %v17_v8  }
  0x12   :  { %75 = vperm.xlu1 %240, %v20_v9   ;;  %70 = vperm.xlu0 %239, %v19_v10  }
  0x16   :  { %85 = vperm.xlu1 %240, %v22_v11   ;;  %80 = vperm.xlu0 %239, %v21_v12  }
  0x1a   :  { %90 = vperm.xlu0 %239, %v23_v13  }
  0x7d   :  { %v41_v16 = vpop.permute.xlu1 %40  ;;  %v31_v17 = vpop.permute.xlu0 %30 }
  0x7e   :  { %v99_v18 = vmul.f32 %v299_v14, %v41_v16  ;;  %v97_v19 = vmul.f32 %v299_v14, %v31_v17 }
  0x80   :  { %v114_v20 = vadd.f32 %v304_v15, %v97_v19  ;;  %v116_v21 = vadd.f32 %v304_v15, %v99_v18 }
  0x81   :  { %v46_v22 = vpop.permute.xlu1 %45  ;;  %v36_v23 = vpop.permute.xlu0 %35 }
  0x82   :  { %v127_v25 = vmax.f32 %v114_v20, 0.0  ;;  %v100_v26 = vmul.f32 %v299_v14, %v46_v22  ;;  %v98_v27 = vmul.f32 %v299_v14, %v36_v23  ;;  %v129_v31 = vmax.f32 %v116_v21, 0.0 }
  0x84   :  { %v117_v28 = vadd.f32 %v304_v15, %v100_v26  ;;  %v115_v29 = vadd.f32 %v304_v15, %v98_v27  ;;  %v144_v30 = vmul.f32 %v313_v24, %v127_v25  ;;  %v146_v45 = vmul.f32 %v313_v24, %v129_v31 }
  0x85   :  { %v56_v32 = vpop.permute.xlu1 %55  ;;  %v51_v33 = vpop.permute.xlu0 %50 }
  0x86   :  { %v130_v34 = vmax.f32 %v117_v28, 0.0  ;;  %v128_v35 = vmax.f32 %v115_v29, 0.0  ;;  %v102_v36 = vmul.f32 %v299_v14, %v56_v32  ;;  %v101_v37 = vmul.f32 %v299_v14, %v51_v33  ;;  %v237_v32 = vld [vmem:[%s417_s1 + $0x3] ss:$0 sm:$0xff] }
  0x87   :  { %v158_v38 = vsel %vm157_vm0, %v144_v30, 0.0  ;;  %v164_v57 = vsel %vm157_vm0, %v146_v45, 0.0 }
  0x88   :  { %v119_v39 = vadd.f32 %v304_v15, %v102_v36  ;;  %v118_v40 = vadd.f32 %v304_v15, %v101_v37  ;;  %159 = vadd.xlane.f32.xlu1 %v158_v38  ;;  %v147_v41 = vmul.f32 %v313_v24, %v130_v34  ;;  %v145_v42 = vmul.f32 %v313_v24, %v128_v35 }
  0x89   :  { %v66_v43 = vpop.permute.xlu1 %65  ;;  %v61_v44 = vpop.permute.xlu0 %60 }
  0x8a   :  { %v132_v46 = vmax.f32 %v119_v39, 0.0  ;;  %v104_v47 = vmul.f32 %v299_v14, %v66_v43  ;;  %v103_v48 = vmul.f32 %v299_v14, %v61_v44  ;;  %v131_v49 = vmax.f32 %v118_v40, 0.0 }
  0x8b   :  { %v167_v50 = vsel %vm157_vm0, %v147_v41, 0.0  ;;  %v161_v51 = vsel %vm157_vm0, %v145_v42, 0.0 }
  0x8c   :  { %v121_v52 = vadd.f32 %v304_v15, %v104_v47  ;;  %v120_v53 = vadd.f32 %v304_v15, %v103_v48  ;;  %168 = vadd.xlane.f32.xlu1 %v167_v50  ;;  %162 = vadd.xlane.f32.xlu0 %v161_v51  ;;  %v149_v54 = vmul.f32 %v313_v24, %v132_v46 }
  0x8d   :  { %v76_v55 = vpop.permute.xlu1 %75  ;;  %v71_v56 = vpop.permute.xlu0 %70  ;;  %v148_v63 = vmul.f32 %v313_v24, %v131_v49 }
  0x8e   :  { %v134_v58 = vmax.f32 %v121_v52, 0.0  ;;  %v106_v59 = vmul.f32 %v299_v14, %v76_v55  ;;  %v105_v60 = vmul.f32 %v299_v14, %v71_v56  ;;  %v133_v61 = vmax.f32 %v120_v53, 0.0 }
  0x8f   :  { %v173_v62 = vsel %vm157_vm0, %v149_v54, 0.0  ;;  %v170_v10 = vsel %vm157_vm0, %v148_v63, 0.0 }
  0x90   :  { %v123_v0 = vadd.f32 %v304_v15, %v106_v59  ;;  %v122_v1 = vadd.f32 %v304_v15, %v105_v60  ;;  %174 = vadd.xlane.f32.xlu1 %v173_v62  ;;  %165 = vadd.xlane.f32.xlu0 %v164_v57  ;;  %v151_v2 = vmul.f32 %v313_v24, %v134_v58 }
  0x91   :  { %v86_v3 = vpop.permute.xlu1 %85  ;;  %v81_v4 = vpop.permute.xlu0 %80  ;;  %v150_v11 = vmul.f32 %v313_v24, %v133_v61 }
  0x92   :  { %v136_v5 = vmax.f32 %v123_v0, 0.0  ;;  %v108_v6 = vmul.f32 %v299_v14, %v86_v3  ;;  %v107_v7 = vmul.f32 %v299_v14, %v81_v4  ;;  %v135_v8 = vmax.f32 %v122_v1, 0.0 }
  0x93   :  { %v179_v9 = vsel %vm157_vm0, %v151_v2, 0.0  ;;  %v176_v22 = vsel %vm157_vm0, %v150_v11, 0.0 }
  0x94   :  { %v125_v12 = vadd.f32 %v304_v15, %v108_v6  ;;  %v124_v13 = vadd.f32 %v304_v15, %v107_v7  ;;  %180 = vadd.xlane.f32.xlu1 %v179_v9  ;;  %171 = vadd.xlane.f32.xlu0 %v170_v10  ;;  %v153_v16 = vmul.f32 %v313_v24, %v136_v5 }
  0x95   :  { %v91_v17 = vpop.permute.xlu0 %90  ;;  %v152_v23 = vmul.f32 %v313_v24, %v135_v8 }
  0x96   :  { %v138_v18 = vmax.f32 %v125_v12, 0.0  ;;  %v109_v19 = vmul.f32 %v299_v14, %v91_v17  ;;  %v185_v20 = vsel %vm157_vm0, %v153_v16, 0.0  ;;  %v137_v21 = vmax.f32 %v124_v13, 0.0 }
  0x97   :  { %v182_v29 = vsel %vm157_vm0, %v152_v23, 0.0 }
  0x98   :  { %v126_v25 = vadd.f32 %v304_v15, %v109_v19  ;;  %186 = vadd.xlane.f32.xlu1 %v185_v20  ;;  %177 = vadd.xlane.f32.xlu0 %v176_v22  ;;  %v155_v26 = vmul.f32 %v313_v24, %v138_v18  ;;  %v154_v14 = vmul.f32 %v313_v24, %v137_v21 }
  0x9a   :  { %v191_v27 = vsel %vm157_vm0, %v155_v26, 0.0  ;;  %v139_v28 = vmax.f32 %v126_v25, 0.0  ;;  %v188_v30 = vsel %vm157_vm0, %v154_v14, 0.0 }
  0x9c   :  { %192 = vadd.xlane.f32.xlu1 %v191_v27  ;;  %183 = vadd.xlane.f32.xlu0 %v182_v29  ;;  %v156_v31 = vmul.f32 %v313_v24, %v139_v28 }
  0x9e   :  { %v195_v15 = vsel %vm194_vm1, %v156_v31, 0.0 }
  0xa0   :  { %189 = vadd.xlane.f32.xlu0 %v188_v30 }
  0xa4   :  { %196 = vadd.xlane.f32.xlu0 %v195_v15 }
 0x111   :  { %v160_v33 = vpop.xlane.xlu1 %159 }
 0x112   :  { %v202_v34 = vadd.f32 %v237_v32, %v160_v33 }
 0x114   :  { %216 = vst.msk [vmem:[%s418_s2] sm:$0xff] %vm215_vm2, %v202_v34 }
 0x115   :  { %v169_v35 = vpop.xlane.xlu1 %168  ;;  %v163_v36 = vpop.xlane.xlu0 %162 }
 0x116   :  { %v205_v37 = vadd.f32 %v237_v32, %v169_v35  ;;  %v203_v24 = vadd.f32 %v237_v32, %v163_v36 }
 0x118   :  { %219 = vst.msk [vmem:[%s418_s2 + $0x18] sm:$0xff] %vm215_vm2, %v205_v37  ;;  %217 = vst.msk [vmem:[%s418_s2 + $0x8] sm:$0xff] %vm215_vm2, %v203_v24 }
 0x119   :  { %v175_v38 = vpop.xlane.xlu1 %174  ;;  %v166_v39 = vpop.xlane.xlu0 %165 }
 0x11a   :  { %v207_v40 = vadd.f32 %v237_v32, %v175_v38  ;;  %v204_v41 = vadd.f32 %v237_v32, %v166_v39 }
 0x11c   :  { %221 = vst.msk [vmem:[%s418_s2 + $0x28] sm:$0xff] %vm215_vm2, %v207_v40  ;;  %218 = vst.msk [vmem:[%s418_s2 + $0x10] sm:$0xff] %vm215_vm2, %v204_v41 }
 0x11d   :  { %v181_v42 = vpop.xlane.xlu1 %180  ;;  %v172_v43 = vpop.xlane.xlu0 %171 }
 0x11e   :  { %v209_v44 = vadd.f32 %v237_v32, %v181_v42  ;;  %v206_v45 = vadd.f32 %v237_v32, %v172_v43 }
 0x120   :  { %223 = vst.msk [vmem:[%s418_s2 + $0x38] sm:$0xff] %vm215_vm2, %v209_v44  ;;  %220 = vst.msk [vmem:[%s418_s2 + $0x20] sm:$0xff] %vm215_vm2, %v206_v45 }
 0x121   :  { %v187_v46 = vpop.xlane.xlu1 %186  ;;  %v178_v47 = vpop.xlane.xlu0 %177 }
 0x122   :  { %v211_v48 = vadd.f32 %v237_v32, %v187_v46  ;;  %v208_v49 = vadd.f32 %v237_v32, %v178_v47 }
 0x124   :  { %225 = vst.msk [vmem:[%s418_s2 + $0x48] sm:$0xff] %vm215_vm2, %v211_v48  ;;  %222 = vst.msk [vmem:[%s418_s2 + $0x30] sm:$0xff] %vm215_vm2, %v208_v49 }
 0x125   :  { %v193_v50 = vpop.xlane.xlu1 %192  ;;  %v184_v51 = vpop.xlane.xlu0 %183 }
 0x126   :  { %v213_v52 = vadd.f32 %v237_v32, %v193_v50  ;;  %v210_v53 = vadd.f32 %v237_v32, %v184_v51 }
 0x128   :  { %227 = vst.msk [vmem:[%s418_s2 + $0x58] sm:$0xff] %vm215_vm2, %v213_v52  ;;  %224 = vst.msk [vmem:[%s418_s2 + $0x40] sm:$0xff] %vm215_vm2, %v210_v53 }
 0x129   :  { %v190_v54 = vpop.xlane.xlu0 %189 }
 0x12a   :  { %v212_v55 = vadd.f32 %v237_v32, %v190_v54 }
 0x12c   :  { %226 = vst.msk [vmem:[%s418_s2 + $0x50] sm:$0xff] %vm215_vm2, %v212_v55 }
 0x12d   :  { %v197_v56 = vpop.xlane.xlu0 %196 }
 0x12e   :  { %v214_v57 = vadd.f32 %v237_v32, %v197_v56 }
 0x130   :  { %229 = vst.msk [vmem:[%s418_s2 + $0x60] sm:$0xf] %vm228_vm3, %v214_v57 }

</bundles_post_ra>
